<compile_context>
chip_gen: v6e
topology: v6e:2x2x1
jax: 0.10.0
libtpu: 0.0.40
codegen_flags: <defaults>
</compile_context>

<pallas_src>
import functools

import jax
import jax.numpy as jnp
from jax.experimental import pallas as pl
from jax.experimental.pallas import tpu as pltpu

EPS = 1e-5
MXU_DTYPE = None  # e.g. jnp.bfloat16 on v6e / v7x


def _round_up(x, m):
    return (x + m - 1) // m * m


# ---------------------------------------------------------------------------
# Pallas kernel: fused  Y = act((X @ W) * scale + bias)
# ---------------------------------------------------------------------------
def _fused_matmul_kernel(x_ref, w_ref, s_ref, b_ref, o_ref, acc_ref, *, relu):
    k = pl.program_id(1)

    @pl.when(k == 0)
    def _init():
        acc_ref[...] = jnp.zeros_like(acc_ref)

    acc_ref[...] += jnp.dot(x_ref[...], w_ref[...],
                            preferred_element_type=jnp.float32)

    @pl.when(k == pl.num_programs(1) - 1)
    def _epilogue():
        y = acc_ref[...] * s_ref[...] + b_ref[...]
        if relu:
            y = jnp.maximum(y, 0.0)
        o_ref[...] = y.astype(o_ref.dtype)


def fused_matmul(x, w, scale, bias, *, relu):
    """act((x @ w) * scale + bias).  x:(M,K)  w:(K,N)  scale,bias:(N,)."""
    M, K = x.shape
    Kw, N = w.shape
    assert K == Kw
    out_dtype = x.dtype

    tile_m = min(256, _round_up(M, 8))
    tile_k = min(512, _round_up(K, 128))
    m_pad = _round_up(M, tile_m)
    k_pad = _round_up(K, tile_k)
    n_pad = _round_up(N, 128)          # lane-dense output even for tiny C_out

    xp = jnp.pad(x, ((0, m_pad - M), (0, k_pad - K)))
    wp = jnp.pad(w, ((0, k_pad - K), (0, n_pad - N)))
    sp = jnp.pad(scale.reshape(1, N).astype(jnp.float32), ((0, 0), (0, n_pad - N)))
    bp = jnp.pad(bias.reshape(1, N).astype(jnp.float32), ((0, 0), (0, n_pad - N)))
    if MXU_DTYPE is not None:          # bf16 MXU operands, f32 accumulation
        xp = xp.astype(MXU_DTYPE)
        wp = wp.astype(MXU_DTYPE)

    grid = (m_pad // tile_m, k_pad // tile_k)
    elt = jnp.dtype(xp.dtype).itemsize
    cost = pl.CostEstimate(
        flops=2 * m_pad * k_pad * n_pad,
        transcendentals=0,
        bytes_accessed=elt * (m_pad * k_pad + k_pad * n_pad)
        + 4 * (m_pad * n_pad + 2 * n_pad),
    )

    out = pl.pallas_call(
        functools.partial(_fused_matmul_kernel, relu=relu),
        out_shape=jax.ShapeDtypeStruct((m_pad, n_pad), out_dtype),
        grid_spec=pltpu.PrefetchScalarGridSpec(
            num_scalar_prefetch=0,
            grid=grid,
            in_specs=[
                pl.BlockSpec((tile_m, tile_k), lambda i, k: (i, k)),
                pl.BlockSpec((tile_k, n_pad), lambda i, k: (k, 0)),
                pl.BlockSpec((1, n_pad), lambda i, k: (0, 0)),
                pl.BlockSpec((1, n_pad), lambda i, k: (0, 0)),
            ],
            out_specs=pl.BlockSpec((tile_m, n_pad), lambda i, k: (i, 0)),
            scratch_shapes=[pltpu.VMEM((tile_m, n_pad), jnp.float32)],
        ),
        compiler_params=pltpu.CompilerParams(
            dimension_semantics=("parallel", "arbitrary")),
        cost_estimate=cost,
    )(xp, wp, sp, bp)
    return out[:M, :N]


# ---------------------------------------------------------------------------
# Conv ops built on the Pallas kernel (NHWC)
# ---------------------------------------------------------------------------
def _im2col3x3(x):
    n, h, w, c = x.shape
    xp = jnp.pad(x, ((0, 0), (1, 1), (1, 1), (0, 0)))
    cols = [xp[:, dy:dy + h, dx:dx + w, :] for dy in range(3) for dx in range(3)]
    return jnp.concatenate(cols, axis=-1)          # (n, h, w, 9*c)


def conv3x3_bn_relu_pallas(x, p):
    """Conv2d(3x3, pad=1, bias) + BatchNorm2d(eval) + ReLU, fused."""
    n, h, w, c = x.shape
    cout = p["w"].shape[-1]
    s = p["gamma"] / jnp.sqrt(p["var"] + EPS)          # fold BN into scale/bias
    b = (p["b"] - p["mean"]) * s + p["beta"]
    patches = _im2col3x3(x).reshape(n * h * w, 9 * c)
    y = fused_matmul(patches, p["w"].reshape(9 * c, cout), s, b, relu=True)
    return y.reshape(n, h, w, cout)


def conv1x1_pallas(x, w, b):
    """Conv2d(1x1, bias), no BN / activation."""
    n, h, ww, c = x.shape
    cout = w.shape[-1]
    y = fused_matmul(x.reshape(n * h * ww, c), w,
                     jnp.ones((cout,), jnp.float32), b, relu=False)
    return y.reshape(n, h, ww, cout)


# ---------------------------------------------------------------------------
# Pure-JAX (XLA) reference conv ops — used only for the correctness check
# ---------------------------------------------------------------------------
def conv3x3_bn_relu_ref(x, p):
    z = jax.lax.conv_general_dilated(
        x, p["w"], window_strides=(1, 1), padding="SAME",
        dimension_numbers=("NHWC", "HWIO", "NHWC")) + p["b"]
    z = (z - p["mean"]) / jnp.sqrt(p["var"] + EPS) * p["gamma"] + p["beta"]
    return jnp.maximum(z, 0.0)


def conv1x1_ref(x, w, b):
    return jnp.einsum("nhwc,cd->nhwd", x, w) + b


# ---------------------------------------------------------------------------
# R2U_Net structure (shared by the Pallas path and the reference path)
# ---------------------------------------------------------------------------
def _maxpool2x2(x):
    n, h, w, c = x.shape
    return x.reshape(n, h // 2, 2, w // 2, 2, c).max(axis=(2, 4))


def _upsample2x(x):                                  # nn.Upsample default = nearest
    return jnp.repeat(jnp.repeat(x, 2, axis=1), 2, axis=2)


def _recurrent_block(x, p, conv3, t):
    # torch: for i in range(t): if i==0: x1=conv(x); x1=conv(x+x1)
    # i.e. one conv(x) then t applications of conv(x + x1), all sharing weights.
    x1 = conv3(x, p)
    for _ in range(t):
        x1 = conv3(x + x1, p)
    return x1


def _rrcnn_block(x, p, conv3, conv1, t):
    x = conv1(x, p["w1x1"], p["b1x1"])
    x1 = _recurrent_block(x, p["rb1"], conv3, t)
    x1 = _recurrent_block(x1, p["rb2"], conv3, t)
    return x + x1


def r2u_net_forward(x_nchw, params, conv3, conv1, t=2):
    x = jnp.transpose(x_nchw, (0, 2, 3, 1))          # NCHW -> NHWC
    x1 = _rrcnn_block(x, params["RRCNN1"], conv3, conv1, t)
    x2 = _rrcnn_block(_maxpool2x2(x1), params["RRCNN2"], conv3, conv1, t)
    x3 = _rrcnn_block(_maxpool2x2(x2), params["RRCNN3"], conv3, conv1, t)
    x4 = _rrcnn_block(_maxpool2x2(x3), params["RRCNN4"], conv3, conv1, t)
    x5 = _rrcnn_block(_maxpool2x2(x4), params["RRCNN5"], conv3, conv1, t)

    d5 = conv3(_upsample2x(x5), params["Up5"])
    d5 = _rrcnn_block(jnp.concatenate([x4, d5], axis=-1),
                      params["Up_RRCNN5"], conv3, conv1, t)
    d4 = conv3(_upsample2x(d5), params["Up4"])
    d4 = _rrcnn_block(jnp.concatenate([x3, d4], axis=-1),
                      params["Up_RRCNN4"], conv3, conv1, t)
    d3 = conv3(_upsample2x(d4), params["Up3"])
    d3 = _rrcnn_block(jnp.concatenate([x2, d3], axis=-1),
                      params["Up_RRCNN3"], conv3, conv1, t)
    d2 = conv3(_upsample2x(d3), params["Up2"])
    d2 = _rrcnn_block(jnp.concatenate([x1, d2], axis=-1),
                      params["Up_RRCNN2"], conv3, conv1, t)

    d1 = conv1(d2, params["final_w"], params["final_b"])
    return jnp.transpose(d1, (0, 3, 1, 2))           # NHWC -> NCHW


# ---------------------------------------------------------------------------
# Parameter construction (eval-mode BatchNorm: running_mean / running_var)
# ---------------------------------------------------------------------------
def _conv3x3_bn_params(key, cin, cout):
    k = jax.random.split(key, 6)
    return dict(
        w=jax.random.normal(k[0], (3, 3, cin, cout), jnp.float32) / jnp.sqrt(9.0 * cin),
        b=0.01 * jax.random.normal(k[1], (cout,), jnp.float32),
        gamma=1.0 + 0.1 * jax.random.normal(k[2], (cout,), jnp.float32),
        beta=0.1 * jax.random.normal(k[3], (cout,), jnp.float32),
        mean=0.1 * jax.random.normal(k[4], (cout,), jnp.float32),
        var=1.0 + 0.1 * jnp.abs(jax.random.normal(k[5], (cout,), jnp.float32)),
    )


def _rrcnn_params(key, cin, cout):
    k = jax.random.split(key, 4)
    return dict(
        w1x1=jax.random.normal(k[0], (cin, cout), jnp.float32) / jnp.sqrt(1.0 * cin),
        b1x1=0.01 * jax.random.normal(k[1], (cout,), jnp.float32),
        rb1=_conv3x3_bn_params(k[2], cout, cout),
        rb2=_conv3x3_bn_params(k[3], cout, cout),
    )


def init_r2u_net_params(key, img_ch=3, output_ch=2,
                        widths=(64, 128, 256, 512, 1024)):
    c1, c2, c3, c4, c5 = widths
    ks = jax.random.split(key, 15)
    return dict(
        RRCNN1=_rrcnn_params(ks[0], img_ch, c1),
        RRCNN2=_rrcnn_params(ks[1], c1, c2),
        RRCNN3=_rrcnn_params(ks[2], c2, c3),
        RRCNN4=_rrcnn_params(ks[3], c3, c4),
        RRCNN5=_rrcnn_params(ks[4], c4, c5),
        Up5=_conv3x3_bn_params(ks[5], c5, c4),
        Up_RRCNN5=_rrcnn_params(ks[6], c5, c4),
        Up4=_conv3x3_bn_params(ks[7], c4, c3),
        Up_RRCNN4=_rrcnn_params(ks[8], c4, c3),
        Up3=_conv3x3_bn_params(ks[9], c3, c2),
        Up_RRCNN3=_rrcnn_params(ks[10], c3, c2),
        Up2=_conv3x3_bn_params(ks[11], c2, c1),
        Up_RRCNN2=_rrcnn_params(ks[12], c2, c1),
        final_w=jax.random.normal(ks[13], (c1, output_ch), jnp.float32) / jnp.sqrt(1.0 * c1),
        final_b=0.01 * jax.random.normal(ks[14], (output_ch,), jnp.float32),
    )


if __name__ == "__main__":
    key = jax.random.PRNGKey(0)
    kp, kx = jax.random.split(key)

    # Small, module-consistent shapes: batch=2, img_ch=3, 16x16 spatial
    # (16 is the minimum that survives the four 2x2 max-pools), output_ch=2.
    params = init_r2u_net_params(kp, img_ch=3, output_ch=2)
    x = jax.random.normal(kx, (2, 3, 16, 16), dtype=jnp.float32)   # NCHW like torch

    out = r2u_net_forward(x, params, conv3x3_bn_relu_pallas, conv1x1_pallas, t=2)
    out = jax.block_until_ready(out)
    assert out.shape == (2, 2, 16, 16)

    ref = r2u_net_forward(x, params, conv3x3_bn_relu_ref, conv1x1_ref, t=2)
    ref = jax.block_until_ready(ref)
    assert jnp.allclose(out, ref, atol=1e-2, rtol=1e-2), "Pallas output mismatch vs XLA reference"

    print("KERNEL_OK")
</pallas_src>

<mosaic_0001>
module attributes {stable_mosaic.version = 11 : i64} {
  func.func @_fused_matmul_kernel(%arg0: i32, %arg1: i32, %arg2: memref<256x128xf32, #tpu.memory_space<vmem>>, %arg3: memref<128x128xf32, #tpu.memory_space<vmem>>, %arg4: memref<1x128xf32, #tpu.memory_space<vmem>>, %arg5: memref<1x128xf32, #tpu.memory_space<vmem>>, %arg6: memref<256x128xf32, #tpu.memory_space<vmem>>, %arg7: memref<256x128xf32, #tpu.memory_space<vmem>>) attributes {dimension_semantics = [#tpu.dimension_semantics<parallel>, #tpu.dimension_semantics<arbitrary>], iteration_bounds = array<i64: 2, 1>, scalar_prefetch = 0 : i64, scratch_operands = 1 : i64, tpu.core_type = #tpu.core_type<tc>, window_params = [{transform_indices = @transform_0, window_bounds = array<i64: 256, 128>}, {transform_indices = @transform_1, window_bounds = array<i64: 128, 128>}, {pipeline_mode = #tpu.pipeline_mode<synchronous>, transform_indices = @transform_2, window_bounds = array<i64: 1, 128>}, {pipeline_mode = #tpu.pipeline_mode<synchronous>, transform_indices = @transform_3, window_bounds = array<i64: 1, 128>}, {transform_indices = @transform_4, window_bounds = array<i64: 256, 128>}]} {
    %c0_i32 = arith.constant 0 : i32
    %0 = arith.cmpi eq, %arg1, %c0_i32 : i32
    %1 = arith.extui %0 : i1 to i32
    %c0_i32_0 = arith.constant 0 : i32
    %2 = arith.cmpi ne, %1, %c0_i32_0 : i32
    scf.if %2 {
      %cst_10 = arith.constant 0.000000e+00 : f32
      %12 = vector.broadcast %cst_10 : f32 to vector<256x128xf32>
      %c0_11 = arith.constant 0 : index
      %c0_12 = arith.constant 0 : index
      %13 = vector.load %arg7[%c0_11, %c0_12] : memref<256x128xf32, #tpu.memory_space<vmem>>, vector<256x128xf32>
      tpu.vector_store %arg7[%c0_11, %c0_12], %12 {strides = array<i32>} : memref<256x128xf32, #tpu.memory_space<vmem>>, vector<256x128xf32>,
    } else {
    }
    %c0 = arith.constant 0 : index
    %c0_1 = arith.constant 0 : index
    %3 = vector.load %arg7[%c0, %c0_1] : memref<256x128xf32, #tpu.memory_space<vmem>>, vector<256x128xf32>
    %c0_2 = arith.constant 0 : index
    %c0_3 = arith.constant 0 : index
    %4 = vector.load %arg2[%c0_2, %c0_3] : memref<256x128xf32, #tpu.memory_space<vmem>>, vector<256x128xf32>
    %c0_4 = arith.constant 0 : index
    %c0_5 = arith.constant 0 : index
    %5 = vector.load %arg3[%c0_4, %c0_5] : memref<128x128xf32, #tpu.memory_space<vmem>>, vector<128x128xf32>
    %cst = arith.constant dense<0.000000e+00> : vector<256x128xf32>
    %6 = tpu.matmul %4, %5, %cst {dimension_numbers = #tpu.dot_dimension_numbers<[1], [0], [0], [1], [0, 0, 1, 1], [], []>} : vector<256x128xf32>, vector<128x128xf32>, vector<256x128xf32> -> vector<256x128xf32>
    %7 = arith.addf %3, %6 : vector<256x128xf32>
    %c0_6 = arith.constant 0 : index
    %c0_7 = arith.constant 0 : index
    %8 = vector.load %arg7[%c0_6, %c0_7] : memref<256x128xf32, #tpu.memory_space<vmem>>, vector<256x128xf32>
    tpu.vector_store %arg7[%c0_6, %c0_7], %7 {strides = array<i32>} : memref<256x128xf32, #tpu.memory_space<vmem>>, vector<256x128xf32>,
    %c0_i32_8 = arith.constant 0 : i32
    %9 = arith.cmpi eq, %arg1, %c0_i32_8 : i32
    %10 = arith.extui %9 : i1 to i32
    %c0_i32_9 = arith.constant 0 : i32
    %11 = arith.cmpi ne, %10, %c0_i32_9 : i32
    scf.if %11 {
      %c0_10 = arith.constant 0 : index
      %c0_11 = arith.constant 0 : index
      %12 = vector.load %arg7[%c0_10, %c0_11] : memref<256x128xf32, #tpu.memory_space<vmem>>, vector<256x128xf32>
      %c0_12 = arith.constant 0 : index
      %c0_13 = arith.constant 0 : index
      %13 = vector.load %arg4[%c0_12, %c0_13] : memref<1x128xf32, #tpu.memory_space<vmem>>, vector<1x128xf32>
      %14 = vector.broadcast %13 : vector<1x128xf32> to vector<256x128xf32>
      %15 = arith.mulf %12, %14 : vector<256x128xf32>
      %c0_14 = arith.constant 0 : index
      %c0_15 = arith.constant 0 : index
      %16 = vector.load %arg5[%c0_14, %c0_15] : memref<1x128xf32, #tpu.memory_space<vmem>>, vector<1x128xf32>
      %17 = vector.broadcast %16 : vector<1x128xf32> to vector<256x128xf32>
      %18 = arith.addf %15, %17 : vector<256x128xf32>
      %c0_16 = arith.constant 0 : index
      %c0_17 = arith.constant 0 : index
      %19 = vector.load %arg6[%c0_16, %c0_17] : memref<256x128xf32, #tpu.memory_space<vmem>>, vector<256x128xf32>
      tpu.vector_store %arg6[%c0_16, %c0_17], %18 {strides = array<i32>} : memref<256x128xf32, #tpu.memory_space<vmem>>, vector<256x128xf32>,
    } else {
    }
    return
  }
  func.func @transform_0(%arg0: i32, %arg1: i32) -> (i32, i32) {
    %c0_i32 = arith.constant 0 : i32
    return %arg0, %arg1 : i32, i32
  }
  func.func @transform_1(%arg0: i32, %arg1: i32) -> (i32, i32) {
    %c0_i32 = arith.constant 0 : i32
    %c0_i32_0 = arith.constant 0 : i32
    return %arg1, %c0_i32 : i32, i32
  }
  func.func @transform_2(%arg0: i32, %arg1: i32) -> (i32, i32) {
    %c0_i32 = arith.constant 0 : i32
    %c0_i32_0 = arith.constant 0 : i32
    %c0_i32_1 = arith.constant 0 : i32
    return %c0_i32, %c0_i32_0 : i32, i32
  }
  func.func @transform_3(%arg0: i32, %arg1: i32) -> (i32, i32) {
    %c0_i32 = arith.constant 0 : i32
    %c0_i32_0 = arith.constant 0 : i32
    %c0_i32_1 = arith.constant 0 : i32
    return %c0_i32, %c0_i32_0 : i32, i32
  }
  func.func @transform_4(%arg0: i32, %arg1: i32) -> (i32, i32) {
    %c0_i32 = arith.constant 0 : i32
    %c0_i32_0 = arith.constant 0 : i32
    return %arg0, %c0_i32 : i32, i32
  }
}

</mosaic_0001>

<bundles_post_ra>
// kernel: tpu_custom_call.1
= control target key start
LH: loop header
LB: loop body
LE: loop exit
PB: predicated region body
PF: predicated region fallthrough
CT: control target
= control target key end

     0   :  { %s1680_s0 = inlined_call_operand.hbm [shape: f32[512,128], index: 0, kind: input, shape index: {}]   ;;  %s1681_s1 = inlined_call_operand.hbm [shape: f32[128,128], index: 1, kind: input, shape index: {}]   ;;  %s1682_s2 = inlined_call_operand.vmem [shape: f32[1,128], index: 2, kind: input, shape index: {}]   ;;  %s1683_s3 = inlined_call_operand.vmem [shape: f32[1,128], index: 3, kind: input, shape index: {}]   ;;  %s1684_s4 = inlined_call_operand.hbm [shape: f32[512,128], index: 4, kind: output, shape index: {}]  }
   0x1   :  { %1688 = sst [smem:[#allocation12_spill]] %s1681_s1 }
   0x2   :  { %9 = vsyncpa [#allocation4], 0 }
   0x3   :  { %11 = vsyncpa [#allocation4 + $0x1], 0 }
   0x4   :  { %12 = vsyncpa [#allocation7], 0 }
   0x5   :  { %13 = vsyncpa [#allocation5], 0 }
   0x6   :  { %15 = vsyncpa [#allocation5 + $0x1], 0  ;;  %s1346_s15 = smov 0   ;;  %s1348_s16 = smov 0  }
   0x7   :  { %s1350_s17 = smov 0   ;;  %s1352_s18 = smov 0  }
   0x8   :  { %s1354_s19 = smov 0   ;;  %s1356_s20 = smov 0  }
   0x9 LB: > { %s916_s21 = sadd.s32 4294967295, %s1312_s20   ;;  %s917_s22 = sadd.s32 4294967294, %s1312_s20   ;;  %s1312_s20 = sphi %s1356_s20, %s21_s20   ;;  %s1308_s19 = sphi %s1354_s19, %s1708_s19   ;;  %s1304_s18 = sphi %s1352_s18, %s1707_s18   ;;  %s1300_s17 = sphi %s1350_s17, %s1706_s17   ;;  %s1296_s16 = sphi %s1348_s16, %s1705_s16   ;;  %s1292_s15 = sphi %s1346_s15, %s1704_s15  }
   0xa   : > { %p55_p0 = scmp.ne.s32.totalorder %s1296_s16, %s1292_s15  ;;  %p1380_p1 = scmp.eq.s32.totalorder %s916_s21, 0 }
   0xb   : > { %p1384_p2 = scmp.eq.s32.totalorder %s916_s21, 1  ;;  %p153_p3 = scmp.eq.s32.totalorder %s917_s22, 1 }
   0xc   : > { %p1390_p4 = por %p1380_p1, %p55_p0  ;;  %p918_p5 = scmp.ge.s32.totalorder %s1312_s20, 1 }
   0xd   : > { %p1395_p6 = por %p153_p3, %p55_p0  ;;  %p160_p7 = scmp.lt.s32.totalorder %s1312_s20, 3 }
   0xe   : > { %s1691_s25 = scalar_select %p1390_p4, 1, 0 }
   0xf   : > { %s1692_s26 = scalar_select %p1395_p6, 1, 0 }
  0x10   : > { %p1400_p8 = pnand %p918_p5, %p160_p7  ;;  %s1314_s28 = smov [#allocation6]  }
  0x11   : > { %s175_s29 = sshll.u32 %s1314_s28, 4  ;;  %s33_s5 = sadd.s32 1, %s1308_s19  ;;  %s176_s29 = int_to_ptr.vmem [resolvable:$true] %s175_s29 }
  0x12   : > { %p1105_p9 = pneg %p1400_p8  ;;  %s1185_s6 = scalar_lea.vmem %s176_s29, 2048 }
  0x13   : > { %p1186_p13 = scmp.ne.s32.totalorder %s176_s29, %s1185_s6  ;;  %p1193_p5 = scmp.lt.s32.totalorder %s176_s29, %s176_s29 }
  0x14   : > { %p1409_p11 = pnand %p1105_p9, %p1380_p1  ;;  %p1194_p7 = scmp.lt.s32.totalorder %s1185_s6, %s1185_s6 }
  0x16   : > { %p1176_p12 = pneg %p1409_p11  ;;  %p1195_p6 = por %p1194_p7, %p1193_p5 }
  0x18   : > { %p1188_p0 = pnand %p1186_p13, %p1176_p12 }
  0x1a   : > { %p1189_p3 = pneg %p1188_p0 }
  0x1c   : > { %p1196_p4 = pnand %p1195_p6, %p1189_p3 }
  0x1e   : > { %1199 = shalt.err (!%p1196_p4)
}
  0x1f   : > { %s1686_s7 = smov 128   ;;  %s1687_s8 = smov 8  }
  0x20   : > { %s1695_s1 = sld [smem:[#allocation12_spill]]  ;;  %p35_p4 = scmp.ge.s32.totalorder %s33_s5, 2 }
  0x21   : > { %s42_s11 = sadd.s32 1, %s1300_s17  ;;  %p49_p6 = scmp.ne.s32.totalorder %s1300_s17, %s1296_s16 }
  0x22   : > { %p50_p9 = scmp.eq.s32.totalorder %s1312_s20, 0  ;;  %s1710_s5 = smov (%p35_p4, %s33_s5), 0 }
  0x23   : > { %p1436_p13 = por %p1384_p2, %p49_p6  ;;  %s37_s14 = ssub.s32 %s1308_s19, %s1710_s5 }
  0x24   : > { %p1430_p12 = por %p50_p9, %p49_p6  ;;  %p1118_p0 = scmp.lt.s32.totalorder %s1312_s20, 2 }
  0x25   : > { %s195_s21 = sand.u32 1, %s1300_s17  }
  0x26   : > { %1108 = dma.hbm_to_vmem [thread:$0]  (!%p1409_p11), %s1695_s1, 2048, %s176_s29, [#allocation7], %s1686_s7, %s1686_s7, %s1687_s8  }
  0x27   : > { %p40_p11 = scmp.eq.s32.totalorder %s37_s14, 0  ;;  %s921_s22 = sshll.u32 %s195_s21, 8 }
  0x28   : > { %s935_s29 = sshll.u32 %s1308_s19, 12  ;;  %s199_s10 = scalar_lea.vmem [#allocation3], %s921_s22 }
  0x29   : > { %s1445_s28 = scalar_select %p40_p11, %s1300_s17, %s42_s11  }
  0x2a   : > { %s206_s9 = scalar_lea.hbm %s1680_s0, %s935_s29  ;;  %s207_s7 = sshll.u32 %s199_s10, 4  ;;  %s208_s7 = int_to_ptr.vmem [resolvable:$true] %s207_s7 }
  0x2b   : > { %p1453_p2 = pnand %p1118_p0, %p1430_p12  ;;  %s196_s8 = scalar_lea.sflag [#allocation4], %s195_s21 }
  0x2c   : > { %s1213_s14 = scalar_lea.vmem %s208_s7, 4096  ;;  %s1317_s11 = smov [#allocation3]  }
  0x2d   : > { %p1202_p3 = pneg %p1453_p2  ;;  %p1214_p5 = scmp.ne.s32.totalorder %s208_s7, %s1213_s14 }
  0x2e   : > { %s1218_s1 = sshll.u32 %s1317_s11, 4  ;;  %s1219_s1 = int_to_ptr.vmem [resolvable:$false] %s1218_s1 }
  0x2f   : > { %p1216_p7 = pnand %p1214_p5, %p1202_p3  ;;  %s1220_s29 = scalar_lea.vmem %s1219_s1, 8192 }
  0x30   : > { %p1221_p6 = scmp.lt.s32.totalorder %s208_s7, %s1219_s1  ;;  %p1222_p9 = scmp.lt.s32.totalorder %s1220_s29, %s1213_s14 }
  0x31   : > { %p1217_p4 = pneg %p1216_p7 }
  0x32   : > { %p1223_p11 = por %p1222_p9, %p1221_p6 }
  0x34   : > { %p1224_p10 = pnand %p1223_p11, %p1217_p4 }
  0x36   : > { %1227 = shalt.err (!%p1224_p10)
}
  0x37   : > { %s1699_s12 = smov 8   ;;  %s1700_s22 = smov 128  }
  0x38   : > { %1112 = dma.hbm_to_vmem [thread:$0]  (!%p1453_p2), %s206_s9, 4096, %s208_s7, %s196_s8, %s1700_s22, %s1700_s22, %s1699_s12  }
  0x39   : > { %219 = sbr.rel (%p1400_p8) target bundleno = 340 (0x154), region = 36  ;;  %s1467_s21 = sand.u32 (!%p1400_p8), 1, %s1296_s16  }
  0x3a   : > { %s925_s1 = sshll.u32 (!%p1400_p8), %s1467_s21, 8  ;;  %s222_s30 = scalar_lea.sflag (!%p1400_p8), [#allocation4], %s1467_s21 }
  0x3b   : > { %s1473_s6 = scalar_lea.vmem (!%p1400_p8), [#allocation3], %s925_s1  ;;  %p1701_p10 = scmp.ne.s32.totalorder (!%p1400_p8), %s1691_s25, 0 }
  0x3e   : > { %1279 = dma.done.wait (%p1701_p10), %s222_s30, 4096  }
  0x3f   : > { %1281 = vsyncadd (%p1701_p10), %s222_s30, 4294963200 }
  0x40   : > { %1283 = dma.done.wait (%p1380_p1), [#allocation7], 2048  }
  0x41   : > { %1285 = vsyncadd (%p1380_p1), [#allocation7], 4294965248  ;;  %v372_v0 = vld [vmem:[#allocation6 + $0x78] sm:$0xff]  ;;  %v371_v1 = vld [vmem:[#allocation6 + $0x70] sm:$0xff]  ;;  %s1533_s8 = scalar_lea.vmem [#allocation8], %s925_s1  ;;  %s936_s9 = sshll.u32 %s1304_s18, 12 }
  0x42   : > { %985 = vmatprep.subr.mxu0 %v372_v0  ;;  %1065 = vmatprep.subr.mxu1 %v372_v0  ;;  %v370_v2 = vld [vmem:[#allocation6 + $0x68] sm:$0xff]  ;;  %v369_v3 = vld [vmem:[#allocation6 + $0x60] sm:$0xff]  ;;  %v368_v4 = vld [vmem:[#allocation6 + $0x58] sm:$0xff]  ;;  %s821_s10 = sshll.u32 %s1533_s8, 4  ;;  %s1624_s18 = scalar_lea.hbm %s1684_s4, %s936_s9  ;;  %s1626_s10 = int_to_ptr.vmem [resolvable:$true] %s821_s10 }
  0x43   : > { %986 = vmatpush3.msra.mxu0 %v372_v0  ;;  %1081 = vmatpush3.msra.mxu1 %v372_v0  ;;  %v367_v5 = vld [vmem:[#allocation6 + $0x50] sm:$0xff]  ;;  %v366_v6 = vld [vmem:[#allocation6 + $0x48] sm:$0xff]  ;;  %v365_v7 = vld [vmem:[#allocation6 + $0x40] sm:$0xff]  ;;  %s808_s11 = scalar_lea.sflag [#allocation5], %s1467_s21  ;;  %s1228_s29 = scalar_lea.vmem %s1626_s10, 4096 }
  0x44   : > { %987 = vmatprep.subr.mxu0 %v371_v1  ;;  %1066 = vmatprep.subr.mxu1 %v371_v1  ;;  %v364_v8 = vld [vmem:[#allocation6 + $0x38] sm:$0xff]  ;;  %v363_v9 = vld [vmem:[#allocation6 + $0x30] sm:$0xff]  ;;  %v362_v10 = vld [vmem:[#allocation6 + $0x28] sm:$0xff]  ;;  %p1229_p1 = scmp.ne.s32.totalorder %s1626_s10, %s1228_s29  ;;  %s1318_s12 = smov [#allocation8]  }
  0x45   : > { %988 = vmatpush3.msra.mxu0 %v371_v1  ;;  %1082 = vmatpush3.msra.mxu1 %v371_v1  ;;  %v361_v11 = vld [vmem:[#allocation6 + $0x20] sm:$0xff]  ;;  %v360_v12 = vld [vmem:[#allocation6 + $0x18] sm:$0xff]  ;;  %v359_v13 = vld [vmem:[#allocation6 + $0x10] sm:$0xff]  ;;  %s1232_s22 = sshll.u32 %s1318_s12, 4  ;;  %s1233_s22 = int_to_ptr.vmem [resolvable:$false] %s1232_s22 }
  0x46   : > { %989 = vmatprep.subr.mxu0 %v370_v2  ;;  %1067 = vmatprep.subr.mxu1 %v370_v2  ;;  %v358_v14 = vld [vmem:[#allocation6 + $0x8] sm:$0xff]  ;;  %v357_v15 = vld [vmem:[#allocation6] sm:$0xff]  ;;  %v327_v20 = vld [vmem:[%s1473_s6 + $0x10] sm:$0xff]  ;;  %p1230_p8 = pnand %p1229_p1, %p1436_p13  ;;  %s1234_s1 = scalar_lea.vmem %s1233_s22, 8192 }
  0x47   : > { %990 = vmatpush3.msra.mxu0 %v370_v2  ;;  %1083 = vmatpush3.msra.mxu1 %v370_v2  ;;  %v325_v16 = vld [vmem:[%s1473_s6] sm:$0xff]  ;;  %v326_v18 = vld [vmem:[%s1473_s6 + $0x8] sm:$0xff]  ;;  %v343_v21 = vld [vmem:[%s1473_s6 + $0x90] sm:$0xff]  ;;  %p1235_p0 = scmp.lt.s32.totalorder %s1626_s10, %s1233_s22  ;;  %p1236_p2 = scmp.lt.s32.totalorder %s1234_s1, %s1228_s29 }
  0x48   : > { %991 = vmatprep.subr.mxu0 %v369_v3  ;;  %1068 = vmatprep.subr.mxu1 %v369_v3  ;;  %v341_v17 = vld [vmem:[%s1473_s6 + $0x80] sm:$0xff]  ;;  %v342_v19 = vld [vmem:[%s1473_s6 + $0x88] sm:$0xff]  ;;  %v328_v22 = vld [vmem:[%s1473_s6 + $0x18] sm:$0xff]  ;;  %p1231_p12 = pneg %p1230_p8 }
  0x49   : > { %992 = vmatpush3.msra.mxu0 %v369_v3  ;;  %1084 = vmatpush3.msra.mxu1 %v369_v3  ;;  %v344_v23 = vld [vmem:[%s1473_s6 + $0x98] sm:$0xff]  ;;  %v329_v24 = vld [vmem:[%s1473_s6 + $0x20] sm:$0xff]  ;;  %v330_v26 = vld [vmem:[%s1473_s6 + $0x28] sm:$0xff]  ;;  %p1237_p3 = por %p1236_p2, %p1235_p0 }
  0x4a   : > { %993 = vmatprep.subr.mxu0 %v368_v4  ;;  %1069 = vmatprep.subr.mxu1 %v368_v4  ;;  %v345_v25 = vld [vmem:[%s1473_s6 + $0xa0] sm:$0xff]  ;;  %v346_v27 = vld [vmem:[%s1473_s6 + $0xa8] sm:$0xff]  ;;  %v331_v28 = vld [vmem:[%s1473_s6 + $0x30] sm:$0xff] }
  0x4b   : > { %994 = vmatpush3.msra.mxu0 %v368_v4  ;;  %1085 = vmatpush3.msra.mxu1 %v368_v4  ;;  %v347_v29 = vld [vmem:[%s1473_s6 + $0xb0] sm:$0xff]  ;;  %v332_v30 = vld [vmem:[%s1473_s6 + $0x38] sm:$0xff]  ;;  %v333_v32 = vld [vmem:[%s1473_s6 + $0x40] sm:$0xff]  ;;  %p1238_p5 = pnand %p1237_p3, %p1231_p12 }
  0x4c   : > { %995 = vmatprep.subr.mxu0 %v367_v5  ;;  %1070 = vmatprep.subr.mxu1 %v367_v5  ;;  %v348_v31 = vld [vmem:[%s1473_s6 + $0xb8] sm:$0xff]  ;;  %v349_v33 = vld [vmem:[%s1473_s6 + $0xc0] sm:$0xff]  ;;  %v334_v34 = vld [vmem:[%s1473_s6 + $0x48] sm:$0xff] }
  0x4d   : > { %996 = vmatpush3.msra.mxu0 %v367_v5  ;;  %1086 = vmatpush3.msra.mxu1 %v367_v5  ;;  %v350_v35 = vld [vmem:[%s1473_s6 + $0xc8] sm:$0xff]  ;;  %v335_v36 = vld [vmem:[%s1473_s6 + $0x50] sm:$0xff]  ;;  %v336_v38 = vld [vmem:[%s1473_s6 + $0x58] sm:$0xff] }
  0x4e   : > { %997 = vmatprep.subr.mxu0 %v366_v6  ;;  %1071 = vmatprep.subr.mxu1 %v366_v6  ;;  %v351_v37 = vld [vmem:[%s1473_s6 + $0xd0] sm:$0xff]  ;;  %v352_v39 = vld [vmem:[%s1473_s6 + $0xd8] sm:$0xff]  ;;  %v337_v40 = vld [vmem:[%s1473_s6 + $0x60] sm:$0xff] }
  0x4f   : > { %998 = vmatpush3.msra.mxu0 %v366_v6  ;;  %1087 = vmatpush3.msra.mxu1 %v366_v6  ;;  %v353_v41 = vld [vmem:[%s1473_s6 + $0xe0] sm:$0xff]  ;;  %v338_v42 = vld [vmem:[%s1473_s6 + $0x68] sm:$0xff]  ;;  %v339_v44 = vld [vmem:[%s1473_s6 + $0x70] sm:$0xff] }
  0x50   : > { %999 = vmatprep.subr.mxu0 %v365_v7  ;;  %1072 = vmatprep.subr.mxu1 %v365_v7  ;;  %v354_v43 = vld [vmem:[%s1473_s6 + $0xe8] sm:$0xff]  ;;  %v355_v45 = vld [vmem:[%s1473_s6 + $0xf0] sm:$0xff]  ;;  %v340_v46 = vld [vmem:[%s1473_s6 + $0x78] sm:$0xff] }
  0x51   : > { %1000 = vmatpush3.msra.mxu0 %v365_v7  ;;  %1088 = vmatpush3.msra.mxu1 %v365_v7  ;;  %v356_v47 = vld [vmem:[%s1473_s6 + $0xf8] sm:$0xff]  ;;  %v1518_v48 = vld [vmem:[%s1682_s2] ss:$0 sm:$0xff] }
  0x52   : > { %1001 = vmatprep.subr.mxu0 %v364_v8  ;;  %1073 = vmatprep.subr.mxu1 %v364_v8  ;;  %v1523_v50 = vld [vmem:[%s1683_s3] ss:$0 sm:$0xff] }
  0x53   : > { %1002 = vmatpush3.msra.mxu0 %v364_v8  ;;  %1089 = vmatpush3.msra.mxu1 %v364_v8 }
  0x54   : > { %1003 = vmatprep.subr.mxu0 %v363_v9  ;;  %1074 = vmatprep.subr.mxu1 %v363_v9 }
  0x55   : > { %1004 = vmatpush3.msra.mxu0 %v363_v9  ;;  %1090 = vmatpush3.msra.mxu1 %v363_v9 }
  0x56   : > { %1005 = vmatprep.subr.mxu0 %v362_v10  ;;  %1075 = vmatprep.subr.mxu1 %v362_v10 }
  0x57   : > { %1006 = vmatpush3.msra.mxu0 %v362_v10  ;;  %1091 = vmatpush3.msra.mxu1 %v362_v10 }
  0x58   : > { %1007 = vmatprep.subr.mxu0 %v361_v11  ;;  %1076 = vmatprep.subr.mxu1 %v361_v11 }
  0x59   : > { %1008 = vmatpush3.msra.mxu0 %v361_v11  ;;  %1092 = vmatpush3.msra.mxu1 %v361_v11 }
  0x5a   : > { %1009 = vmatprep.subr.mxu0 %v360_v12  ;;  %1077 = vmatprep.subr.mxu1 %v360_v12 }
  0x5b   : > { %1010 = vmatpush3.msra.mxu0 %v360_v12  ;;  %1093 = vmatpush3.msra.mxu1 %v360_v12 }
  0x5c   : > { %1011 = vmatprep.subr.mxu0 %v359_v13  ;;  %1078 = vmatprep.subr.mxu1 %v359_v13 }
  0x5d   : > { %1012 = vmatpush3.msra.mxu0 %v359_v13  ;;  %1094 = vmatpush3.msra.mxu1 %v359_v13 }
  0x5e   : > { %1013 = vmatprep.subr.mxu0 %v358_v14  ;;  %1079 = vmatprep.subr.mxu1 %v358_v14 }
  0x5f   : > { %1014 = vmatpush3.msra.mxu0 %v358_v14  ;;  %1095 = vmatpush3.msra.mxu1 %v358_v14 }
  0x60   : > { %1015 = vmatprep.subr.mxu0 %v357_v15  ;;  %1080 = vmatprep.subr.mxu1 %v357_v15 }
  0x61   : > { %1016 = vmatpush3.msra.mxu0 %v357_v15  ;;  %1096 = vmatpush3.msra.mxu1 %v357_v15 }
  0x62   : > { %1017 = vmatprep.mubr.f32.mxu0 %v325_v16  ;;  %1041 = vmatprep.mubr.f32.mxu1 %v341_v17 }
  0x63   : > { %1018 = vmatmul.mubr.f32.vlgmr.msra.gmra.mxu0 %v326_v18  ;;  %1042 = vmatmul.mubr.f32.vlgmr.msra.gmra.mxu1 %v342_v19 }
  0x64   : > { %1020 = vmatprep.mubr.f32.mxu0 %v327_v20  ;;  %1044 = vmatprep.mubr.f32.mxu1 %v343_v21 }
  0x67   : > { %1021 = vmatmul.mubr.f32.gmra.mxu0 %v328_v22  ;;  %1045 = vmatmul.mubr.f32.gmra.mxu1 %v344_v23 }
  0x68   : > { %1023 = vmatprep.mubr.f32.mxu0 %v329_v24  ;;  %1047 = vmatprep.mubr.f32.mxu1 %v345_v25 }
  0x6b   : > { %1024 = vmatmul.mubr.f32.gmra.mxu0 %v330_v26  ;;  %1048 = vmatmul.mubr.f32.gmra.mxu1 %v346_v27 }
  0x6c   : > { %1026 = vmatprep.mubr.f32.mxu0 %v331_v28  ;;  %1050 = vmatprep.mubr.f32.mxu1 %v347_v29 }
  0x6f   : > { %1027 = vmatmul.mubr.f32.gmra.mxu0 %v332_v30  ;;  %1051 = vmatmul.mubr.f32.gmra.mxu1 %v348_v31 }
  0x70   : > { %1029 = vmatprep.mubr.f32.mxu0 %v333_v32  ;;  %1053 = vmatprep.mubr.f32.mxu1 %v349_v33 }
  0x73   : > { %1030 = vmatmul.mubr.f32.gmra.mxu0 %v334_v34  ;;  %1054 = vmatmul.mubr.f32.gmra.mxu1 %v350_v35 }
  0x74   : > { %1032 = vmatprep.mubr.f32.mxu0 %v335_v36  ;;  %1056 = vmatprep.mubr.f32.mxu1 %v351_v37 }
  0x77   : > { %1033 = vmatmul.mubr.f32.gmra.mxu0 %v336_v38  ;;  %1057 = vmatmul.mubr.f32.gmra.mxu1 %v352_v39 }
  0x78   : > { %1035 = vmatprep.mubr.f32.mxu0 %v337_v40  ;;  %1059 = vmatprep.mubr.f32.mxu1 %v353_v41 }
  0x7b   : > { %1036 = vmatmul.mubr.f32.gmra.mxu0 %v338_v42  ;;  %1060 = vmatmul.mubr.f32.gmra.mxu1 %v354_v43 }
  0x7c   : > { %1038 = vmatprep.mubr.f32.mxu0 %v339_v44  ;;  %1062 = vmatprep.mubr.f32.mxu1 %v355_v45 }
  0x7f   : > { %1039 = vmatmul.mubr.f32.gmra.mxu0 %v340_v46  ;;  %1063 = vmatmul.mubr.f32.gmra.mxu1 %v356_v47 }
 0x123   : > { %v1019_v49 = vpop.f32.mrf.mxu0  ;;  %v1043_v51 = vpop.f32.mrf.mxu1 }
 0x124   : > { %v705_v52 = vmul.f32 %v1019_v49, %v1518_v48  ;;  %v721_v53 = vmul.f32 %v1043_v51, %v1518_v48 }
 0x125   : > { %v439_v54 = vpop.f32.mrf.mxu0  ;;  %v519_v55 = vpop.f32.mrf.mxu1 }
 0x126   : > { %v744_v56 = vadd.f32 %v1523_v50, %v705_v52  ;;  %v760_v57 = vadd.f32 %v1523_v50, %v721_v53  ;;  %v704_v58 = vmul.f32 %v1518_v48, %v439_v54  ;;  %v720_v59 = vmul.f32 %v1518_v48, %v519_v55 }
 0x127   : > { %v1022_v60 = vpop.f32.mrf.mxu0  ;;  %v1046_v61 = vpop.f32.mrf.mxu1 }
 0x128   : > { %776 = vst [vmem:[%s1533_s8 + $0x8] sm:$0xff] %v744_v56  ;;  %792 = vst [vmem:[%s1533_s8 + $0x88] sm:$0xff] %v760_v57  ;;  %v743_v62 = vadd.f32 %v1523_v50, %v704_v58  ;;  %v759_v63 = vadd.f32 %v1523_v50, %v720_v59  ;;  %v707_v0 = vmul.f32 %v1022_v60, %v1518_v48 }
 0x129   : > { %v723_v1 = vmul.f32 %v1046_v61, %v1518_v48  ;;  %v449_v2 = vpop.f32.mrf.mxu0  ;;  %v529_v3 = vpop.f32.mrf.mxu1 }
 0x12a   : > { %775 = vst [vmem:[%s1533_s8] sm:$0xff] %v743_v62  ;;  %791 = vst [vmem:[%s1533_s8 + $0x80] sm:$0xff] %v759_v63  ;;  %v746_v4 = vadd.f32 %v1523_v50, %v707_v0  ;;  %v706_v6 = vmul.f32 %v1518_v48, %v449_v2  ;;  %v722_v7 = vmul.f32 %v1518_v48, %v529_v3 }
 0x12b   : > { %v762_v5 = vadd.f32 %v1523_v50, %v723_v1  ;;  %v1025_v8 = vpop.f32.mrf.mxu0  ;;  %v1049_v9 = vpop.f32.mrf.mxu1 }
 0x12c   : > { %778 = vst [vmem:[%s1533_s8 + $0x18] sm:$0xff] %v746_v4  ;;  %v745_v10 = vadd.f32 %v1523_v50, %v706_v6  ;;  %v761_v11 = vadd.f32 %v1523_v50, %v722_v7  ;;  %v709_v12 = vmul.f32 %v1025_v8, %v1518_v48  ;;  %v725_v13 = vmul.f32 %v1049_v9, %v1518_v48 }
 0x12d   : > { %794 = vst [vmem:[%s1533_s8 + $0x98] sm:$0xff] %v762_v5  ;;  %v459_v14 = vpop.f32.mrf.mxu0  ;;  %v539_v15 = vpop.f32.mrf.mxu1 }
 0x12e   : > { %777 = vst [vmem:[%s1533_s8 + $0x10] sm:$0xff] %v745_v10  ;;  %793 = vst [vmem:[%s1533_s8 + $0x90] sm:$0xff] %v761_v11  ;;  %v748_v16 = vadd.f32 %v1523_v50, %v709_v12  ;;  %v764_v17 = vadd.f32 %v1523_v50, %v725_v13  ;;  %v708_v18 = vmul.f32 %v1518_v48, %v459_v14 }
 0x12f   : > { %v724_v19 = vmul.f32 %v1518_v48, %v539_v15  ;;  %v1028_v20 = vpop.f32.mrf.mxu0  ;;  %v1052_v21 = vpop.f32.mrf.mxu1 }
 0x130   : > { %780 = vst [vmem:[%s1533_s8 + $0x28] sm:$0xff] %v748_v16  ;;  %796 = vst [vmem:[%s1533_s8 + $0xa8] sm:$0xff] %v764_v17  ;;  %v747_v22 = vadd.f32 %v1523_v50, %v708_v18  ;;  %v711_v24 = vmul.f32 %v1028_v20, %v1518_v48  ;;  %v727_v25 = vmul.f32 %v1052_v21, %v1518_v48 }
 0x131   : > { %v763_v23 = vadd.f32 %v1523_v50, %v724_v19  ;;  %v469_v26 = vpop.f32.mrf.mxu0  ;;  %v549_v27 = vpop.f32.mrf.mxu1 }
 0x132   : > { %779 = vst [vmem:[%s1533_s8 + $0x20] sm:$0xff] %v747_v22  ;;  %v750_v28 = vadd.f32 %v1523_v50, %v711_v24  ;;  %v766_v29 = vadd.f32 %v1523_v50, %v727_v25  ;;  %v710_v30 = vmul.f32 %v1518_v48, %v469_v26  ;;  %v726_v31 = vmul.f32 %v1518_v48, %v549_v27 }
 0x133   : > { %795 = vst [vmem:[%s1533_s8 + $0xa0] sm:$0xff] %v763_v23  ;;  %v1031_v32 = vpop.f32.mrf.mxu0  ;;  %v1055_v33 = vpop.f32.mrf.mxu1 }
 0x134   : > { %782 = vst [vmem:[%s1533_s8 + $0x38] sm:$0xff] %v750_v28  ;;  %798 = vst [vmem:[%s1533_s8 + $0xb8] sm:$0xff] %v766_v29  ;;  %v749_v34 = vadd.f32 %v1523_v50, %v710_v30  ;;  %v765_v35 = vadd.f32 %v1523_v50, %v726_v31  ;;  %v713_v36 = vmul.f32 %v1031_v32, %v1518_v48 }
 0x135   : > { %v729_v37 = vmul.f32 %v1055_v33, %v1518_v48  ;;  %v479_v38 = vpop.f32.mrf.mxu0  ;;  %v559_v39 = vpop.f32.mrf.mxu1 }
 0x136   : > { %781 = vst [vmem:[%s1533_s8 + $0x30] sm:$0xff] %v749_v34  ;;  %797 = vst [vmem:[%s1533_s8 + $0xb0] sm:$0xff] %v765_v35  ;;  %v752_v40 = vadd.f32 %v1523_v50, %v713_v36  ;;  %v712_v42 = vmul.f32 %v1518_v48, %v479_v38  ;;  %v728_v43 = vmul.f32 %v1518_v48, %v559_v39 }
 0x137   : > { %v768_v41 = vadd.f32 %v1523_v50, %v729_v37  ;;  %v1034_v44 = vpop.f32.mrf.mxu0  ;;  %v1058_v45 = vpop.f32.mrf.mxu1 }
 0x138   : > { %784 = vst [vmem:[%s1533_s8 + $0x48] sm:$0xff] %v752_v40  ;;  %v751_v46 = vadd.f32 %v1523_v50, %v712_v42  ;;  %v767_v47 = vadd.f32 %v1523_v50, %v728_v43  ;;  %v715_v49 = vmul.f32 %v1034_v44, %v1518_v48  ;;  %v731_v51 = vmul.f32 %v1058_v45, %v1518_v48 }
 0x139   : > { %800 = vst [vmem:[%s1533_s8 + $0xc8] sm:$0xff] %v768_v41  ;;  %v489_v52 = vpop.f32.mrf.mxu0  ;;  %v569_v53 = vpop.f32.mrf.mxu1 }
 0x13a   : > { %783 = vst [vmem:[%s1533_s8 + $0x40] sm:$0xff] %v751_v46  ;;  %799 = vst [vmem:[%s1533_s8 + $0xc0] sm:$0xff] %v767_v47  ;;  %v754_v54 = vadd.f32 %v1523_v50, %v715_v49  ;;  %v770_v55 = vadd.f32 %v1523_v50, %v731_v51  ;;  %v714_v56 = vmul.f32 %v1518_v48, %v489_v52 }
 0x13b   : > { %v730_v57 = vmul.f32 %v1518_v48, %v569_v53  ;;  %v1037_v58 = vpop.f32.mrf.mxu0  ;;  %v1061_v59 = vpop.f32.mrf.mxu1 }
 0x13c   : > { %786 = vst [vmem:[%s1533_s8 + $0x58] sm:$0xff] %v754_v54  ;;  %802 = vst [vmem:[%s1533_s8 + $0xd8] sm:$0xff] %v770_v55  ;;  %v753_v60 = vadd.f32 %v1523_v50, %v714_v56  ;;  %v717_v62 = vmul.f32 %v1037_v58, %v1518_v48  ;;  %v733_v63 = vmul.f32 %v1061_v59, %v1518_v48 }
 0x13d   : > { %v769_v61 = vadd.f32 %v1523_v50, %v730_v57  ;;  %v499_v0 = vpop.f32.mrf.mxu0  ;;  %v579_v1 = vpop.f32.mrf.mxu1 }
 0x13e   : > { %785 = vst [vmem:[%s1533_s8 + $0x50] sm:$0xff] %v753_v60  ;;  %v756_v2 = vadd.f32 %v1523_v50, %v717_v62  ;;  %v772_v3 = vadd.f32 %v1523_v50, %v733_v63  ;;  %v716_v4 = vmul.f32 %v1518_v48, %v499_v0  ;;  %v732_v5 = vmul.f32 %v1518_v48, %v579_v1 }
 0x13f   : > { %801 = vst [vmem:[%s1533_s8 + $0xd0] sm:$0xff] %v769_v61  ;;  %v1040_v6 = vpop.f32.mrf.mxu0  ;;  %v1064_v7 = vpop.f32.mrf.mxu1 }
 0x140   : > { %788 = vst [vmem:[%s1533_s8 + $0x68] sm:$0xff] %v756_v2  ;;  %804 = vst [vmem:[%s1533_s8 + $0xe8] sm:$0xff] %v772_v3  ;;  %v755_v8 = vadd.f32 %v1523_v50, %v716_v4  ;;  %v771_v9 = vadd.f32 %v1523_v50, %v732_v5  ;;  %v719_v10 = vmul.f32 %v1040_v6, %v1518_v48 }
 0x141   : > { %v735_v11 = vmul.f32 %v1064_v7, %v1518_v48  ;;  %v509_v12 = vpop.f32.mrf.mxu0  ;;  %v589_v13 = vpop.f32.mrf.mxu1 }
 0x142   : > { %787 = vst [vmem:[%s1533_s8 + $0x60] sm:$0xff] %v755_v8  ;;  %803 = vst [vmem:[%s1533_s8 + $0xe0] sm:$0xff] %v771_v9  ;;  %v758_v14 = vadd.f32 %v1523_v50, %v719_v10  ;;  %v718_v16 = vmul.f32 %v1518_v48, %v509_v12  ;;  %v734_v17 = vmul.f32 %v1518_v48, %v589_v13 }
 0x143   : > { %v774_v15 = vadd.f32 %v1523_v50, %v735_v11 }
 0x144   : > { %790 = vst [vmem:[%s1533_s8 + $0x78] sm:$0xff] %v758_v14  ;;  %v757_v18 = vadd.f32 %v1523_v50, %v718_v16  ;;  %v773_v19 = vadd.f32 %v1523_v50, %v734_v17 }
 0x145   : > { %806 = vst [vmem:[%s1533_s8 + $0xf8] sm:$0xff] %v774_v15 }
 0x146   : > { %789 = vst [vmem:[%s1533_s8 + $0x70] sm:$0xff] %v757_v18  ;;  %805 = vst [vmem:[%s1533_s8 + $0xf0] sm:$0xff] %v773_v19 }
 0x147   : > { %1241 = shalt.err (!%p1238_p5)
}
 0x148   : > { %s1242_s30 = scalar_lea.hbm %s1624_s18, 4096  ;;  %s1246_s25 = scalar_lea.hbm %s1684_s4, 8192 }
 0x149   : > { %p1243_p7 = scmp.ne.s32.totalorder %s1624_s18, %s1242_s30  ;;  %p1247_p9 = scmp.lt.s32.totalorder %s1624_s18, %s1684_s4 }
 0x14a   : > { %p1248_p11 = scmp.lt.s32.totalorder %s1246_s25, %s1242_s30 }
 0x14b   : > { %p1244_p4 = pnand %p1243_p7, %p1436_p13 }
 0x14c   : > { %p1249_p10 = por %p1248_p11, %p1247_p9 }
 0x14d   : > { %p1245_p6 = pneg %p1244_p4 }
 0x14f   : > { %p1250_p1 = pnand %p1249_p10, %p1245_p6 }
 0x151   : > { %1253 = shalt.err (!%p1250_p1)
}
 0x152   : > { %s1319_s8 = smov 128   ;;  %s1320_s9 = smov 8  }
 0x153   : > { %1103 = dma.vmem_to_hbm [thread:$0]  (%p1436_p13), %s1626_s10, 4096, %s1624_s18, %s808_s11, %s1319_s8, %s1319_s8, %s1320_s9  }
 0x154 PF: > { %s836_s24 = sand.u32 1, %s1292_s15   ;;  %p1702_p8 = scmp.ne.s32.totalorder %s1692_s26, 0 }
 0x155   : > { %p1703_p12 = scmp.ge.s32.totalorder %s1312_s20, 2  ;;  %s837_s14 = scalar_lea.sflag [#allocation5], %s836_s24 }
 0x157   : > { %p1114_p0 = pnand %p1703_p12, %p1702_p8 }
 0x159   : > { %p1115_p2 = pneg %p1114_p0 }
 0x15b   : > { %1287 = dma.done.wait (%p1115_p2), %s837_s14, 4096  }
 0x15c   : > { %1289 = vsyncadd (%p1115_p2), %s837_s14, 4294963200  ;;  %s21_s20 = sadd.s32 1, %s1312_s20   ;;  %s1704_s15 = smov %s1296_s16 }
 0x15d   : > { %p18_p3 = scmp.ge.s32.totalorder %s21_s20, 4   ;;  %s1705_s16 = smov %s1300_s17 }
 0x15e   : > { %s1706_s17 = smov %s1445_s28  ;;  %s1707_s18 = smov %s1308_s19 }
 0x15f   : > { %s1708_s19 = smov %s1710_s5  ;;  %20 = sbr.rel (!%p18_p3) target bundleno = 9 (0x9), region = 94 }
 0x164   :  { %842 = vsyncpa [#allocation4], 1 }
 0x165   :  { %844 = vsyncpa [#allocation4 + $0x1], 1 }
 0x166   :  { %845 = vsyncpa [#allocation7], 1 }
 0x167   :  { %846 = vsyncpa [#allocation5], 1 }
 0x168   :  { %848 = vsyncpa [#allocation5 + $0x1], 1 }

</bundles_post_ra>
